<compile_context>
chip_gen: v5e
topology: v5e:2x2
jax: 0.10.0
libtpu: 0.0.40
codegen_flags: <defaults>
</compile_context>

<pallas_src>
import functools
import math

import jax
import jax.numpy as jnp
from jax.experimental import pallas as pl
from jax.experimental.pallas import tpu as pltpu

_LANE = 128
_SUBLANE = 8
# Fallback spatial tile cap, measured in *input-dtype* bytes (dtype-aware).
_MAX_TILE_BYTES = 4 * 1024 * 1024
# Fused path: per-sample gate and per-block target, in f32-equivalent bytes.
# footprint ~ 2*in + 2*out + ~2 f32 temps ≈ 6x block  ->  ~24-32 MiB, safe under the
# 48 MiB scoped limit on every generation (v7x has only 64 MiB physical VMEM).
_FUSED_SAMPLE_BYTES = 4 * 1024 * 1024
_VMEM_LIMIT_BYTES = 48 * 1024 * 1024


# --------------------------------------------------------------------------- fused
def _fused_kernel(x_ref, w_ref, b_ref, o_ref, *, inv_count: float, eps: float):
    """Whole-sample(s) resident: stats (two-pass variance) + normalize + affine."""
    x = x_ref[...].astype(jnp.float32)                                    # (Nb,Cf,Wf)
    s = jnp.sum(jnp.sum(x, axis=2, keepdims=True), axis=1, keepdims=True)  # (Nb,1,1)
    mean = s * inv_count
    xc = x - mean
    ss = jnp.sum(jnp.sum(xc * xc, axis=2, keepdims=True), axis=1, keepdims=True)
    inv = jax.lax.rsqrt(ss * inv_count + eps)                              # (Nb,1,1)
    a = w_ref[...] * inv                                                   # (Nb,Cf,1)
    o_ref[...] = (xc * a + b_ref[...]).astype(o_ref.dtype)


# ----------------------------------------------------------------------- fallback
def _stats_kernel(x_ref, mean_ref, inv_ref, *, inv_count: float, eps: float,
                  wf: int, tile: int, ragged: bool):
    """Accumulate sum / sum-of-squares over spatial tiles; finalize to mean, 1/std."""
    t = pl.program_id(1)

    @pl.when(t == 0)
    def _():
        mean_ref[...] = jnp.zeros_like(mean_ref)
        inv_ref[...] = jnp.zeros_like(inv_ref)

    x = x_ref[...].astype(jnp.float32)                                    # (1,Cf,T)
    if ragged:
        # Last tile extends past Wf: Pallas gives unspecified values there — mask
        # them out of the statistics (replaces the old wrapper-side jnp.pad).
        lane = jax.lax.broadcasted_iota(jnp.int32, x.shape, 2)
        x = jnp.where(lane < (wf - t * tile), x, 0.0)
    mean_ref[...] += jnp.sum(jnp.sum(x, axis=2, keepdims=True), axis=1, keepdims=True)
    inv_ref[...] += jnp.sum(jnp.sum(x * x, axis=2, keepdims=True), axis=1, keepdims=True)

    @pl.when(t == pl.num_programs(1) - 1)
    def _():
        mean = mean_ref[...] * inv_count
        # One-pass variance; clamp >= 0 guards cancellation when |mean| >> std.
        var = jnp.maximum(inv_ref[...] * inv_count - mean * mean, 0.0)
        mean_ref[...] = mean
        inv_ref[...] = jax.lax.rsqrt(var + eps)


def _norm_kernel(x_ref, a_ref, c_ref, o_ref):
    """o = x * a + c; a/c are pre-folded per-sample, per-channel scale/shift."""
    x = x_ref[...].astype(jnp.float32)                                    # (1,Cf,T)
    o_ref[...] = (x * a_ref[...] + c_ref[...]).astype(o_ref.dtype)
    # (Out-of-bounds lanes of the ragged last tile are dropped by Pallas on store.)


# ------------------------------------------------------------------------ wrapper
def layer_norm(x: jax.Array, weight: jax.Array | None, bias: jax.Array | None,
               eps: float = 1e-5, *, force_two_pass: bool = False) -> jax.Array:
    """Equivalent of torch.nn.functional.group_norm(x, 1, weight, bias, eps)."""
    N, C, H, W = x.shape
    HW = H * W
    count = C * HW
    inv_count = 1.0 / float(count)
    itemsize = jnp.dtype(x.dtype).itemsize

    if weight is None:
        weight = jnp.ones((C,), jnp.float32)
    if bias is None:
        bias = jnp.zeros((C,), jnp.float32)

    # dtype-aware sublane fold: target 8 rows for f32, 16 for bf16, 32 for int8/fp8.
    sub = max(_SUBLANE, 32 // max(itemsize, 1))
    k = sub // math.gcd(C, sub)
    while k > 1 and HW % k != 0:
        k //= 2
    Cf = C * k
    Wf = HW // k

    x3 = x.reshape(N, Cf, Wf)
    w3 = jnp.repeat(weight.astype(jnp.float32), k).reshape(1, Cf, 1)
    b3 = jnp.repeat(bias.astype(jnp.float32), k).reshape(1, Cf, 1)

    sample_f32_bytes = Cf * Wf * 4

    # ---------------- fused single-pass path (common case) ----------------
    if not force_two_pass and sample_f32_bytes <= _FUSED_SAMPLE_BYTES:
        Nb = max(1, min(N, _FUSED_SAMPLE_BYTES // sample_f32_bytes))
        while N % Nb != 0:          # keep full blocks; Nb=1 always divides
            Nb -= 1
        kern = functools.partial(_fused_kernel, inv_count=inv_count, eps=float(eps))
        out3 = pl.pallas_call(
            kern,
            out_shape=jax.ShapeDtypeStruct((N, Cf, Wf), x.dtype),
            grid_spec=pltpu.PrefetchScalarGridSpec(
                num_scalar_prefetch=0,
                grid=(N // Nb,),
                in_specs=[
                    pl.BlockSpec((Nb, Cf, Wf), lambda i: (i, 0, 0)),
                    pl.BlockSpec((1, Cf, 1), lambda i: (0, 0, 0)),
                    pl.BlockSpec((1, Cf, 1), lambda i: (0, 0, 0)),
                ],
                out_specs=pl.BlockSpec((Nb, Cf, Wf), lambda i: (i, 0, 0)),
            ),
            compiler_params=pltpu.CompilerParams(
                dimension_semantics=("parallel",),
                vmem_limit_bytes=_VMEM_LIMIT_BYTES),
        )(x3, w3, b3)
        return out3.reshape(N, C, H, W)

    # ---------------- two-pass tiled fallback (oversized samples) ----------------
    t_cap = max(_LANE, (_MAX_TILE_BYTES // (Cf * itemsize)) // _LANE * _LANE)
    wf_up = pl.cdiv(Wf, _LANE) * _LANE
    T = min(t_cap, wf_up)           # multiple of 128 -> lane-dense loads/stores
    n_t = pl.cdiv(Wf, T)
    ragged = (Wf % T) != 0

    # Pass 1: per-sample statistics (mean, 1/std).
    # (Possible further v7x win: split the spatial reduction across both TensorCores
    #  for tiny N; not done here to keep the kernel simple.)
    stats_kernel = functools.partial(
        _stats_kernel, inv_count=inv_count, eps=float(eps),
        wf=Wf, tile=T, ragged=ragged)
    mean, inv = pl.pallas_call(
        stats_kernel,
        out_shape=(jax.ShapeDtypeStruct((N, 1, 1), jnp.float32),
                   jax.ShapeDtypeStruct((N, 1, 1), jnp.float32)),
        grid_spec=pltpu.PrefetchScalarGridSpec(
            num_scalar_prefetch=0,
            grid=(N, n_t),
            in_specs=[pl.BlockSpec((1, Cf, T), lambda n, t: (n, 0, t))],
            out_specs=(pl.BlockSpec((1, 1, 1), lambda n, t: (n, 0, 0)),
                       pl.BlockSpec((1, 1, 1), lambda n, t: (n, 0, 0))),
        ),
        compiler_params=pltpu.CompilerParams(
            dimension_semantics=("parallel", "arbitrary"),
            vmem_limit_bytes=_VMEM_LIMIT_BYTES),
    )(x3)

    # Tiny XLA epilogue: fold per-sample scale/shift once (avoids per-tile (1,1,1)
    # DMAs and per-tile recompute of a/c inside pass 2).
    a = w3 * inv                     # (N, Cf, 1)
    c = b3 - mean * a                # (N, Cf, 1)

    # Pass 2: fused normalize + affine, fully parallel grid, no pad / no slice.
    out3 = pl.pallas_call(
        _norm_kernel,
        out_shape=jax.ShapeDtypeStruct((N, Cf, Wf), x.dtype),
        grid_spec=pltpu.PrefetchScalarGridSpec(
            num_scalar_prefetch=0,
            grid=(N, n_t),
            in_specs=[
                pl.BlockSpec((1, Cf, T), lambda n, t: (n, 0, t)),
                pl.BlockSpec((1, Cf, 1), lambda n, t: (n, 0, 0)),
                pl.BlockSpec((1, Cf, 1), lambda n, t: (n, 0, 0)),
            ],
            out_specs=pl.BlockSpec((1, Cf, T), lambda n, t: (n, 0, t)),
        ),
        compiler_params=pltpu.CompilerParams(
            dimension_semantics=("parallel", "parallel"),
            vmem_limit_bytes=_VMEM_LIMIT_BYTES),
    )(x3, a, c)
    return out3.reshape(N, C, H, W)


def _reference(x, weight, bias, eps=1e-5):
    N, C, H, W = x.shape
    xf = x.reshape(N, -1).astype(jnp.float32)
    mean = xf.mean(axis=1, keepdims=True)
    var = ((xf - mean) ** 2).mean(axis=1, keepdims=True)
    xn = ((xf - mean) / jnp.sqrt(var + eps)).reshape(N, C, H, W)
    return xn * weight[None, :, None, None] + bias[None, :, None, None]


if __name__ == "__main__":
    key = jax.random.PRNGKey(0)
    kx, kw, kb, kx2 = jax.random.split(key, 4)

    # Primary test: module-init parameters (weight=1, bias=0), shape (2, 4, 16, 16).
    N, C, H, W = 2, 4, 16, 16
    x = jax.random.normal(kx, (N, C, H, W), dtype=jnp.float32)
    weight = jnp.ones((C,), dtype=jnp.float32)
    bias = jnp.zeros((C,), dtype=jnp.float32)
    out = jax.block_until_ready(layer_norm(x, weight, bias, eps=1e-5))
    ref = _reference(x, weight, bias, eps=1e-5)
    assert jnp.allclose(out, ref, atol=1e-4, rtol=1e-4), "mismatch (default affine)"

    # Non-trivial affine parameters (fused path).
    w_r = jax.random.normal(kw, (C,), dtype=jnp.float32)
    b_r = jax.random.normal(kb, (C,), dtype=jnp.float32)
    out2 = jax.block_until_ready(layer_norm(x, w_r, b_r, eps=1e-5))
    ref2 = _reference(x, w_r, b_r, eps=1e-5)
    assert jnp.allclose(out2, ref2, atol=1e-4, rtol=1e-4), "mismatch (random affine)"

    # Odd spatial size (HW=49): fused path, non-128 lane extent, no pad / no slice.
    x_odd = jax.random.normal(kx2, (2, 4, 7, 7), dtype=jnp.float32)
    out3 = jax.block_until_ready(layer_norm(x_odd, w_r, b_r, eps=1e-5))
    ref3 = _reference(x_odd, w_r, b_r, eps=1e-5)
    assert jnp.allclose(out3, ref3, atol=1e-4, rtol=1e-4), "mismatch (odd spatial, fused)"

    # Exercise the two-pass fallback on small shapes (including the ragged-tile
    # masking + OOB-store-drop path) without allocating a huge tensor.
    out4 = jax.block_until_ready(layer_norm(x, w_r, b_r, eps=1e-5, force_two_pass=True))
    assert jnp.allclose(out4, ref2, atol=1e-4, rtol=1e-4), "mismatch (two-pass)"
    out5 = jax.block_until_ready(layer_norm(x_odd, w_r, b_r, eps=1e-5, force_two_pass=True))
    assert jnp.allclose(out5, ref3, atol=1e-4, rtol=1e-4), "mismatch (two-pass ragged)"

    print("KERNEL_OK")
</pallas_src>

<mosaic_0001>
module attributes {stable_mosaic.version = 11 : i64} {
  func.func @_fused_kernel(%arg0: i32, %arg1: memref<2x8x128xf32, #tpu.memory_space<vmem>>, %arg2: memref<1x8x1xf32, #tpu.memory_space<vmem>>, %arg3: memref<1x8x1xf32, #tpu.memory_space<vmem>>, %arg4: memref<2x8x128xf32, #tpu.memory_space<vmem>>) attributes {dimension_semantics = [#tpu.dimension_semantics<parallel>], iteration_bounds = array<i64: 1>, scalar_prefetch = 0 : i64, scratch_operands = 0 : i64, tpu.core_type = #tpu.core_type<tc>, window_params = [{transform_indices = @transform_0, window_bounds = array<i64: 2, 8, 128>}, {pipeline_mode = #tpu.pipeline_mode<synchronous>, transform_indices = @transform_1, window_bounds = array<i64: 1, 8, 1>}, {pipeline_mode = #tpu.pipeline_mode<synchronous>, transform_indices = @transform_2, window_bounds = array<i64: 1, 8, 1>}, {transform_indices = @transform_3, window_bounds = array<i64: 2, 8, 128>}]} {
    %c0 = arith.constant 0 : index
    %c0_0 = arith.constant 0 : index
    %c0_1 = arith.constant 0 : index
    %0 = vector.load %arg1[%c0, %c0_0, %c0_1] : memref<2x8x128xf32, #tpu.memory_space<vmem>>, vector<2x8x128xf32>
    %cst = arith.constant dense<0.000000e+00> : vector<2x8xf32>
    %1 = vector.multi_reduction <add>, %0, %cst [2] : vector<2x8x128xf32> to vector<2x8xf32>
    %2 = vector.shape_cast %1 : vector<2x8xf32> to vector<2x8x1xf32>
    %cst_2 = arith.constant dense<0.000000e+00> : vector<2x1xf32>
    %3 = vector.multi_reduction <add>, %2, %cst_2 [1] : vector<2x8x1xf32> to vector<2x1xf32>
    %4 = vector.shape_cast %3 : vector<2x1xf32> to vector<2x1x1xf32>
    %cst_3 = arith.constant 9.765625E-4 : f32
    %5 = vector.broadcast %cst_3 : f32 to vector<2x1x1xf32>
    %6 = arith.mulf %4, %5 : vector<2x1x1xf32>
    %7 = vector.broadcast %6 : vector<2x1x1xf32> to vector<2x8x128xf32>
    %8 = arith.subf %0, %7 : vector<2x8x128xf32>
    %9 = arith.mulf %8, %8 : vector<2x8x128xf32>
    %cst_4 = arith.constant dense<0.000000e+00> : vector<2x8xf32>
    %10 = vector.multi_reduction <add>, %9, %cst_4 [2] : vector<2x8x128xf32> to vector<2x8xf32>
    %11 = vector.shape_cast %10 : vector<2x8xf32> to vector<2x8x1xf32>
    %cst_5 = arith.constant dense<0.000000e+00> : vector<2x1xf32>
    %12 = vector.multi_reduction <add>, %11, %cst_5 [1] : vector<2x8x1xf32> to vector<2x1xf32>
    %13 = vector.shape_cast %12 : vector<2x1xf32> to vector<2x1x1xf32>
    %cst_6 = arith.constant 9.765625E-4 : f32
    %14 = vector.broadcast %cst_6 : f32 to vector<2x1x1xf32>
    %15 = arith.mulf %13, %14 : vector<2x1x1xf32>
    %cst_7 = arith.constant 9.99999974E-6 : f32
    %16 = vector.broadcast %cst_7 : f32 to vector<2x1x1xf32>
    %17 = arith.addf %15, %16 : vector<2x1x1xf32>
    %18 = math.rsqrt %17 : vector<2x1x1xf32>
    %c0_8 = arith.constant 0 : index
    %c0_9 = arith.constant 0 : index
    %c0_10 = arith.constant 0 : index
    %19 = vector.load %arg2[%c0_8, %c0_9, %c0_10] : memref<1x8x1xf32, #tpu.memory_space<vmem>>, vector<1x8x1xf32>
    %20 = vector.broadcast %19 : vector<1x8x1xf32> to vector<2x8x1xf32>
    %21 = vector.broadcast %18 : vector<2x1x1xf32> to vector<2x8x1xf32>
    %22 = arith.mulf %20, %21 : vector<2x8x1xf32>
    %23 = vector.broadcast %22 : vector<2x8x1xf32> to vector<2x8x128xf32>
    %24 = arith.mulf %8, %23 : vector<2x8x128xf32>
    %c0_11 = arith.constant 0 : index
    %c0_12 = arith.constant 0 : index
    %c0_13 = arith.constant 0 : index
    %25 = vector.load %arg3[%c0_11, %c0_12, %c0_13] : memref<1x8x1xf32, #tpu.memory_space<vmem>>, vector<1x8x1xf32>
    %26 = vector.broadcast %25 : vector<1x8x1xf32> to vector<2x8x128xf32>
    %27 = arith.addf %24, %26 : vector<2x8x128xf32>
    %c0_14 = arith.constant 0 : index
    %c0_15 = arith.constant 0 : index
    %c0_16 = arith.constant 0 : index
    %28 = vector.load %arg4[%c0_14, %c0_15, %c0_16] : memref<2x8x128xf32, #tpu.memory_space<vmem>>, vector<2x8x128xf32>
    tpu.vector_store %arg4[%c0_14, %c0_15, %c0_16], %27 {strides = array<i32>} : memref<2x8x128xf32, #tpu.memory_space<vmem>>, vector<2x8x128xf32>,
    return
  }
  func.func @transform_0(%arg0: i32) -> (i32, i32, i32) {
    %c0_i32 = arith.constant 0 : i32
    %c0_i32_0 = arith.constant 0 : i32
    %c0_i32_1 = arith.constant 0 : i32
    return %arg0, %c0_i32, %c0_i32_0 : i32, i32, i32
  }
  func.func @transform_1(%arg0: i32) -> (i32, i32, i32) {
    %c0_i32 = arith.constant 0 : i32
    %c0_i32_0 = arith.constant 0 : i32
    %c0_i32_1 = arith.constant 0 : i32
    %c0_i32_2 = arith.constant 0 : i32
    return %c0_i32, %c0_i32_0, %c0_i32_1 : i32, i32, i32
  }
  func.func @transform_2(%arg0: i32) -> (i32, i32, i32) {
    %c0_i32 = arith.constant 0 : i32
    %c0_i32_0 = arith.constant 0 : i32
    %c0_i32_1 = arith.constant 0 : i32
    %c0_i32_2 = arith.constant 0 : i32
    return %c0_i32, %c0_i32_0, %c0_i32_1 : i32, i32, i32
  }
  func.func @transform_3(%arg0: i32) -> (i32, i32, i32) {
    %c0_i32 = arith.constant 0 : i32
    %c0_i32_0 = arith.constant 0 : i32
    %c0_i32_1 = arith.constant 0 : i32
    return %arg0, %c0_i32, %c0_i32_0 : i32, i32, i32
  }
}

</mosaic_0001>

<bundles_post_ra>
// kernel: tpu_custom_call.1
= control target key start
LH: loop header
LB: loop body
LE: loop exit
PB: predicated region body
PF: predicated region fallthrough
CT: control target
= control target key end

     0   :  { %s197_s0 = inlined_call_operand.vmem [shape: f32[2,8,128], index: 0, kind: input, shape index: {}]   ;;  %s198_s1 = inlined_call_operand.vmem [shape: f32[1,8,1], index: 1, kind: input, shape index: {}]   ;;  %s199_s2 = inlined_call_operand.vmem [shape: f32[1,8,1], index: 2, kind: input, shape index: {}]   ;;  %s200_s3 = inlined_call_operand.hbm [shape: f32[2,8,128], index: 3, kind: output, shape index: {}]  }
   0x1   :  { %v15_v0 = vld [vmem:[%s197_s0] sm:$0xff] }
   0x2   :  { %8 = vsyncpa [#allocation3], 0  ;;  %17 = vadd.xlane.f32.xlu0 %v15_v0  ;;  %v16_v1 = vld [vmem:[%s197_s0 + $0x8] sm:$0xff]  ;;  %v158_v22 = vmov 0   ;;  %v94_v23 = vld [vmem:[%s199_s2] sm:$0xff]  ;;  %s110_s21 = sshll.u32 %s200_s3, 4  ;;  %s111_s21 = int_to_ptr.hbm [resolvable:$true] %s110_s21 }
   0x3   :  { %127 = vset.pattern.permute.xlu0 %v158_v22  ;;  %126 = vset.pattern.permute.xlu2 %v158_v22  ;;  %v79_v50 = vld [vmem:[%s198_s1] sm:$0xff]  ;;  %s159_s1 = smov [#allocation2]   ;;  %s160_s22 = smov 128  }
   0x4   :  { %s108_s18 = sshll.u32 %s159_s1, 4  ;;  %s161_s23 = smov 8   ;;  %s109_s18 = int_to_ptr.vmem [resolvable:$true] %s108_s18 }
   0xa   :  { %19 = vadd.xlane.f32.xlu0 %v16_v1 }
  0x1e   :  { %97 = vperm.xlu0 %127, %v94_v23  }
  0x75   :  { %v18_v2 = vpop.xlane.xlu0 %17 }
  0x76   :  { %v21_v3 = vrot.slane %v18_v2, 4 }
  0x78   :  { %v22_v4 = vadd.f32 %v21_v3, %v18_v2 }
  0x7a   :  { %v23_v5 = vrot.slane %v22_v4, 2 }
  0x7c   :  { %v24_v6 = vadd.f32 %v23_v5, %v22_v4 }
  0x7d   :  { %v20_v7 = vpop.xlane.xlu0 %19 }
  0x7e   :  { %v25_v8 = vrot.slane %v24_v6, 1  ;;  %v27_v9 = vrot.slane %v20_v7, 4 }
  0x80   :  { %v28_v10 = vadd.f32 %v27_v9, %v20_v7  ;;  %v26_v11 = vadd.f32 %v25_v8, %v24_v6 }
  0x82   :  { %v29_v12 = vrot.slane %v28_v10, 2  ;;  %v33_v13 = vmul.f32 0.0009765625, %v26_v11 }
  0x84   :  { %v30_v14 = vadd.f32 %v29_v12, %v28_v10  ;;  %v35_v15 = vsub.f32 %v15_v0, %v33_v13 }
  0x86   :  { %v31_v16 = vrot.slane %v30_v14, 1  ;;  %v37_v17 = vmul.f32 %v35_v15, %v35_v15 }
  0x88   :  { %v32_v18 = vadd.f32 %v31_v16, %v30_v14  ;;  %39 = vadd.xlane.f32.xlu1 %v37_v17 }
  0x8a   :  { %v34_v19 = vmul.f32 0.0009765625, %v32_v18 }
  0x8c   :  { %v36_v20 = vsub.f32 %v16_v1, %v34_v19 }
  0x8e   :  { %v38_v21 = vmul.f32 %v36_v20, %v36_v20 }
  0x90   :  { %41 = vadd.xlane.f32.xlu1 %v38_v21  ;;  %v98_v60 = vpop.permute.xlu0 %97 }
  0xfb   :  { %v40_v24 = vpop.xlane.xlu1 %39 }
  0xfc   :  { %v43_v25 = vrot.slane %v40_v24, 4 }
  0xfe   :  { %v44_v26 = vadd.f32 %v43_v25, %v40_v24 }
 0x100   :  { %v45_v27 = vrot.slane %v44_v26, 2 }
 0x102   :  { %v46_v28 = vadd.f32 %v45_v27, %v44_v26 }
 0x103   :  { %v42_v29 = vpop.xlane.xlu1 %41 }
 0x104   :  { %v47_v30 = vrot.slane %v46_v28, 1  ;;  %v49_v31 = vrot.slane %v42_v29, 4 }
 0x106   :  { %v48_v32 = vadd.f32 %v47_v30, %v46_v28  ;;  %v50_v33 = vadd.f32 %v49_v31, %v42_v29 }
 0x108   :  { %v55_v34 = vmul.f32 0.0009765625, %v48_v32  ;;  %v51_v35 = vrot.slane %v50_v33, 2 }
 0x10a   :  { %v57_v36 = vadd.f32 1e-05, %v55_v34  ;;  %v52_v37 = vadd.f32 %v51_v35, %v50_v33 }
 0x10c   :  { %128 = vrsqrt.f32 %v57_v36  ;;  %v53_v38 = vrot.slane %v52_v37, 1  ;;  %vm65_vm1 = vweird.f32 %v57_v36 }
 0x10e   :  { %v54_v39 = vadd.f32 %v53_v38, %v52_v37 }
 0x110   :  { %v56_v40 = vmul.f32 0.0009765625, %v54_v39 }
 0x112   :  { %v129_v41 = vpop.eup %128  ;;  %v58_v42 = vadd.f32 1e-05, %v56_v40 }
 0x113   :  { %v60_v43 = vmul.f32 %v129_v41, %v57_v36  ;;  %vm66_vm0 = vweird.f32 %v129_v41 }
 0x114   :  { %130 = vrsqrt.f32 %v58_v42  ;;  %vm67_vm2 = vmor %vm65_vm1, %vm66_vm0  ;;  %vm75_vm4 = vweird.f32 %v58_v42 }
 0x115   :  { %v61_v44 = vmul.f32 %v129_v41, %v60_v43 }
 0x117   :  { %v62_v45 = vmul.f32 0.5, %v61_v44 }
 0x119   :  { %v63_v46 = vsub.f32 1.5, %v62_v45 }
 0x11a   :  { %v131_v47 = vpop.eup %130 }
 0x11b   :  { %v70_v48 = vmul.f32 %v131_v47, %v58_v42  ;;  %v64_v49 = vmul.f32 %v129_v41, %v63_v46  ;;  %vm76_vm3 = vweird.f32 %v131_v47 }
 0x11c   :  { %vm77_vm5 = vmor %vm75_vm4, %vm76_vm3 }
 0x11d   :  { %v68_v51 = vsel %vm67_vm2, %v129_v41, %v64_v49  ;;  %v71_v52 = vmul.f32 %v131_v47, %v70_v48 }
 0x11e   :  { %v80_v53 = vmul.f32 %v79_v50, %v68_v51 }
 0x11f   :  { %v72_v54 = vmul.f32 0.5, %v71_v52 }
 0x120   :  { %84 = vperm.xlu2 %126, %v80_v53  }
 0x121   :  { %v73_v55 = vsub.f32 1.5, %v72_v54 }
 0x123   :  { %v74_v56 = vmul.f32 %v131_v47, %v73_v55 }
 0x125   :  { %v78_v57 = vsel %vm77_vm5, %v131_v47, %v74_v56 }
 0x126   :  { %v81_v58 = vmul.f32 %v79_v50, %v78_v57 }
 0x128   :  { %89 = vperm.xlu2 %126, %v81_v58  }
 0x17a   :  { %v85_v59 = vpop.permute.xlu2 %84 }
 0x17b   :  { %v92_v61 = vmul.f32 %v85_v59, %v35_v15 }
 0x17d   :  { %v100_v62 = vadd.f32 %v98_v60, %v92_v61 }
 0x17f   :  { %102 = vst [vmem:[#allocation2] sm:$0xff] %v100_v62 }
 0x182   :  { %v90_v63 = vpop.permute.xlu2 %89 }
 0x183   :  { %v93_v0 = vmul.f32 %v90_v63, %v36_v20 }
 0x185   :  { %v101_v1 = vadd.f32 %v98_v60, %v93_v0 }
 0x187   :  { %103 = vst [vmem:[#allocation2 + $0x8] sm:$0xff] %v101_v1 }
 0x188   :  { %116 = dma.vmem_to_hbm [thread:$0]  %s109_s18, 256, %s111_s21, [#allocation3], %s160_s22, %s160_s22, %s161_s23  }
 0x189   :  { %156 = dma.done.wait [#allocation3], 256  }
 0x18a   :  { %157 = vsyncadd [#allocation3], 4294967040 }
 0x18b   :  { %121 = vsyncpa [#allocation3], 1 }

</bundles_post_ra>
